<compile_context>
chip_gen: v6e
topology: v6e:2x2x1
jax: 0.10.0
libtpu: 0.0.40
codegen_flags: <defaults>
</compile_context>

<pallas_src>
import functools

import jax
import jax.numpy as jnp
from jax.experimental import pallas as pl
from jax.experimental.pallas import tpu as pltpu

_MARGIN = 2.0
_EPS = 1e-6  # torch.nn.functional.pairwise_distance default eps


def _contrastive_kernel(o1_ref, o2_ref, lbl_ref, out_ref, *,
                        margin, batch, block_rows):
    i = pl.program_id(0)

    # Zero the resident accumulator on the first grid step.
    @pl.when(i == 0)
    def _():
        out_ref[...] = jnp.zeros_like(out_ref)

    # Upcast to f32 immediately (free VPU slack; required on v5e for bf16 in).
    o1 = o1_ref[...].astype(jnp.float32)                      # (TB, D)
    o2 = o2_ref[...].astype(jnp.float32)                      # (TB, D)
    diff = o1 - o2 + _EPS                                     # VPU
    sq_dist = jnp.sum(diff * diff, axis=-1, keepdims=True)    # (TB, 1) lane reduce
    dist = jnp.sqrt(sq_dist)                                  # (TB, 1)

    lbl = lbl_ref[...].astype(jnp.float32)                    # (TB, 1)
    hinge = jnp.maximum(margin - dist, 0.0)
    per_row = (1.0 - lbl) * sq_dist + lbl * hinge * hinge     # (TB, 1)

    # Mask rows past the true batch size (ragged last block: the un-DMA'd part
    # of the VMEM buffer is undefined, so this must stay a SELECT, never a mul).
    row = jax.lax.broadcasted_iota(jnp.int32, per_row.shape, 0)
    valid = (i * block_rows + row) < batch
    masked = jnp.where(valid, per_row, 0.0)

    # Running SUM across grid steps (not mean-of-means).
    out_ref[...] += jnp.sum(masked, axis=0, keepdims=True)    # (1, 1)

    # Finalize: divide by the true batch size on the last step.
    @pl.when(i == pl.num_programs(0) - 1)
    def _():
        out_ref[...] = out_ref[...] * (1.0 / batch)


def _choose_block_rows(batch, dim, in_itemsize, target_block_bytes, max_block_rows):
    """Rows per tile, sized by bytes (f32 compute footprint), sublane-aligned."""
    row_align = 8 if in_itemsize >= 4 else 16      # f32 sublanes / packed bf16 rows
    rows = max(target_block_bytes // (4 * dim), row_align)
    rows = min(rows, max_block_rows)
    rows = max((rows // row_align) * row_align, row_align)
    if batch >= row_align:
        rows = min(rows, (batch // row_align) * row_align)
    return rows


def contrastive_loss(output1, output2, label, margin=_MARGIN,
                     target_block_bytes=2 << 20, max_block_rows=2048):
    """output1/output2: (B, D) f32|bf16|f16; label: (B, 1). Returns f32 scalar."""
    B, D = output1.shape
    assert output2.shape == (B, D)
    assert label.shape == (B, 1)

    in_itemsize = output1.dtype.itemsize
    tb = _choose_block_rows(B, D, in_itemsize, target_block_bytes, max_block_rows)
    n_tiles = -(-B // tb)   # ragged last block handled in-kernel, no padding pass

    # VMEM budget: 2 inputs x 2 pipeline buffers + label buffers + f32 temps
    # (upcasts + diff) + lane-padded (tb,1) per-row temporaries.
    block_in = tb * D * in_itemsize
    block_f32 = tb * D * 4
    row_buf = tb * 512                                   # (tb,1) f32, lane-padded
    vmem_need = 2 * 2 * block_in + 2 * row_buf + 3 * block_f32 + 8 * row_buf
    vmem_limit = int(min(48 << 20, max(2 * vmem_need, 16 << 20)))

    kernel = functools.partial(
        _contrastive_kernel, margin=float(margin), batch=B, block_rows=tb)

    cost = pl.CostEstimate(
        flops=4 * B * D + 8 * B,
        transcendentals=B,
        bytes_accessed=2 * B * D * in_itemsize + B * label.dtype.itemsize + 4)

    out = pl.pallas_call(
        kernel,
        out_shape=jax.ShapeDtypeStruct((1, 1), jnp.float32),
        grid=(n_tiles,),
        in_specs=[
            pl.BlockSpec((tb, D), lambda i: (i, 0)),   # output1 tile
            pl.BlockSpec((tb, D), lambda i: (i, 0)),   # output2 tile
            pl.BlockSpec((tb, 1), lambda i: (i, 0)),   # label tile
        ],
        # Same block every grid step -> resident VMEM accumulator.
        out_specs=pl.BlockSpec((1, 1), lambda i: (0, 0)),
        compiler_params=pltpu.CompilerParams(
            dimension_semantics=("arbitrary",),
            vmem_limit_bytes=vmem_limit),
        cost_estimate=cost,
    )(output1, output2, label)
    return out[0, 0]


def _reference(output1, output2, label, margin=_MARGIN):
    # Pure-JAX reference mirroring the torch forward (computed in f32).
    o1 = output1.astype(jnp.float32)
    o2 = output2.astype(jnp.float32)
    lbl = label.astype(jnp.float32)
    d = jnp.sqrt(jnp.sum((o1 - o2 + _EPS) ** 2, axis=-1, keepdims=True))
    return jnp.mean((1.0 - lbl) * d ** 2
                    + lbl * jnp.maximum(margin - d, 0.0) ** 2)


if __name__ == "__main__":
    key = jax.random.PRNGKey(0)
    k1, k2, k3, k4, k5, k6, k7, k8, k9 = jax.random.split(key, 9)

    # 1) Small shapes consistent with the module: batch=8, embedding dim=32.
    B, D = 8, 32
    o1 = jax.random.normal(k1, (B, D), dtype=jnp.float32)
    o2 = jax.random.normal(k2, (B, D), dtype=jnp.float32)
    lbl = jax.random.bernoulli(k3, 0.5, (B, 1)).astype(jnp.float32)

    loss = jax.block_until_ready(contrastive_loss(o1, o2, lbl))
    ref = _reference(o1, o2, lbl)
    assert jnp.allclose(loss, ref, rtol=1e-5, atol=1e-5), (loss, ref)

    # 2) Multi-tile + ragged batch WITHOUT padding: B=20 with 8-row tiles
    #    exercises the grid, the running-sum accumulator, and the partial
    #    last-block masking.
    B2, D2 = 20, 32
    o1b = jax.random.normal(k4, (B2, D2), dtype=jnp.float32)
    o2b = jax.random.normal(k5, (B2, D2), dtype=jnp.float32)
    lblb = jax.random.bernoulli(k6, 0.5, (B2, 1)).astype(jnp.float32)

    loss2 = jax.block_until_ready(
        contrastive_loss(o1b, o2b, lblb, max_block_rows=8))
    ref2 = _reference(o1b, o2b, lblb)
    assert jnp.allclose(loss2, ref2, rtol=1e-5, atol=1e-5), (loss2, ref2)

    # 3) bf16 embeddings (half the HBM bytes), upcast inside the kernel.
    B3, D3 = 16, 32
    o1c = jax.random.normal(k7, (B3, D3), dtype=jnp.float32).astype(jnp.bfloat16)
    o2c = jax.random.normal(k8, (B3, D3), dtype=jnp.float32).astype(jnp.bfloat16)
    lblc = jax.random.bernoulli(k9, 0.5, (B3, 1)).astype(jnp.float32)

    loss3 = jax.block_until_ready(contrastive_loss(o1c, o2c, lblc))
    ref3 = _reference(o1c, o2c, lblc)
    assert jnp.allclose(loss3, ref3, rtol=2e-2, atol=2e-2), (loss3, ref3)

    print("KERNEL_OK")
</pallas_src>

<mosaic_0001>
module attributes {stable_mosaic.version = 11 : i64} {
  func.func @_contrastive_kernel(%arg0: i32, %arg1: memref<8x32xf32, #tpu.memory_space<vmem>>, %arg2: memref<8x32xf32, #tpu.memory_space<vmem>>, %arg3: memref<8x1xf32, #tpu.memory_space<vmem>>, %arg4: memref<1x1xf32, #tpu.memory_space<vmem>>) attributes {dimension_semantics = [#tpu.dimension_semantics<arbitrary>], iteration_bounds = array<i64: 1>, scalar_prefetch = 0 : i64, scratch_operands = 0 : i64, tpu.core_type = #tpu.core_type<tc>, window_params = [{transform_indices = @transform_0, window_bounds = array<i64: 8, 32>}, {transform_indices = @transform_1, window_bounds = array<i64: 8, 32>}, {transform_indices = @transform_2, window_bounds = array<i64: 8, 1>}, {pipeline_mode = #tpu.pipeline_mode<synchronous>, transform_indices = @transform_3, window_bounds = array<i64: 1, 1>}]} {
    %c0_i32 = arith.constant 0 : i32
    %0 = arith.cmpi eq, %arg0, %c0_i32 : i32
    %1 = arith.extui %0 : i1 to i32
    %c0_i32_0 = arith.constant 0 : i32
    %2 = arith.cmpi ne, %1, %c0_i32_0 : i32
    scf.if %2 {
      %cst_19 = arith.constant 0.000000e+00 : f32
      %39 = vector.broadcast %cst_19 : f32 to vector<1x1xf32>
      %c0_20 = arith.constant 0 : index
      %c0_21 = arith.constant 0 : index
      %40 = vector.load %arg4[%c0_20, %c0_21] : memref<1x1xf32, #tpu.memory_space<vmem>>, vector<1x1xf32>
      tpu.vector_store %arg4[%c0_20, %c0_21], %39 {strides = array<i32>} : memref<1x1xf32, #tpu.memory_space<vmem>>, vector<1x1xf32>,
    } else {
    }
    %c0 = arith.constant 0 : index
    %c0_1 = arith.constant 0 : index
    %3 = vector.load %arg1[%c0, %c0_1] : memref<8x32xf32, #tpu.memory_space<vmem>>, vector<8x32xf32>
    %c0_2 = arith.constant 0 : index
    %c0_3 = arith.constant 0 : index
    %4 = vector.load %arg2[%c0_2, %c0_3] : memref<8x32xf32, #tpu.memory_space<vmem>>, vector<8x32xf32>
    %5 = arith.subf %3, %4 : vector<8x32xf32>
    %cst = arith.constant 9.99999997E-7 : f32
    %6 = vector.broadcast %cst : f32 to vector<8x32xf32>
    %7 = arith.addf %5, %6 : vector<8x32xf32>
    %8 = arith.mulf %7, %7 : vector<8x32xf32>
    %cst_4 = arith.constant dense<0.000000e+00> : vector<8xf32>
    %9 = vector.multi_reduction <add>, %8, %cst_4 [1] : vector<8x32xf32> to vector<8xf32>
    %10 = vector.shape_cast %9 : vector<8xf32> to vector<8x1xf32>
    %11 = math.sqrt %10 : vector<8x1xf32>
    %c0_5 = arith.constant 0 : index
    %c0_6 = arith.constant 0 : index
    %12 = vector.load %arg3[%c0_5, %c0_6] : memref<8x1xf32, #tpu.memory_space<vmem>>, vector<8x1xf32>
    %cst_7 = arith.constant 2.000000e+00 : f32
    %13 = vector.broadcast %cst_7 : f32 to vector<8x1xf32>
    %14 = arith.subf %13, %11 : vector<8x1xf32>
    %cst_8 = arith.constant 0.000000e+00 : f32
    %15 = vector.broadcast %cst_8 : f32 to vector<8x1xf32>
    %16 = arith.maximumf %14, %15 : vector<8x1xf32>
    %cst_9 = arith.constant 1.000000e+00 : f32
    %17 = vector.broadcast %cst_9 : f32 to vector<8x1xf32>
    %18 = arith.subf %17, %12 : vector<8x1xf32>
    %19 = arith.mulf %18, %10 : vector<8x1xf32>
    %20 = arith.mulf %12, %16 : vector<8x1xf32>
    %21 = arith.mulf %20, %16 : vector<8x1xf32>
    %22 = arith.addf %19, %21 : vector<8x1xf32>
    %23 = tpu.iota {dimensions = array<i32: 0>} : vector<8x1xi32>
    %c8_i32 = arith.constant 8 : i32
    %24 = arith.muli %arg0, %c8_i32 : i32
    %25 = vector.broadcast %24 : i32 to vector<8x1xi32>
    %26 = arith.addi %25, %23 : vector<8x1xi32>
    %c8_i32_10 = arith.constant 8 : i32
    %27 = vector.broadcast %c8_i32_10 : i32 to vector<8x1xi32>
    %28 = arith.cmpi slt, %26, %27 : vector<8x1xi32>
    %cst_11 = arith.constant 0.000000e+00 : f32
    %29 = vector.broadcast %cst_11 : f32 to vector<8x1xf32>
    %30 = arith.select %28, %22, %29 : vector<8x1xi1>, vector<8x1xf32>
    %c0_12 = arith.constant 0 : index
    %c0_13 = arith.constant 0 : index
    %31 = vector.load %arg4[%c0_12, %c0_13] : memref<1x1xf32, #tpu.memory_space<vmem>>, vector<1x1xf32>
    %cst_14 = arith.constant dense<0.000000e+00> : vector<1xf32>
    %32 = vector.multi_reduction <add>, %30, %cst_14 [0] : vector<8x1xf32> to vector<1xf32>
    %33 = vector.shape_cast %32 : vector<1xf32> to vector<1x1xf32>
    %34 = arith.addf %31, %33 : vector<1x1xf32>
    %c0_15 = arith.constant 0 : index
    %c0_16 = arith.constant 0 : index
    %35 = vector.load %arg4[%c0_15, %c0_16] : memref<1x1xf32, #tpu.memory_space<vmem>>, vector<1x1xf32>
    tpu.vector_store %arg4[%c0_15, %c0_16], %34 {strides = array<i32>} : memref<1x1xf32, #tpu.memory_space<vmem>>, vector<1x1xf32>,
    %c0_i32_17 = arith.constant 0 : i32
    %36 = arith.cmpi eq, %arg0, %c0_i32_17 : i32
    %37 = arith.extui %36 : i1 to i32
    %c0_i32_18 = arith.constant 0 : i32
    %38 = arith.cmpi ne, %37, %c0_i32_18 : i32
    scf.if %38 {
      %c0_19 = arith.constant 0 : index
      %c0_20 = arith.constant 0 : index
      %39 = vector.load %arg4[%c0_19, %c0_20] : memref<1x1xf32, #tpu.memory_space<vmem>>, vector<1x1xf32>
      %cst_21 = arith.constant 1.250000e-01 : f32
      %40 = vector.broadcast %cst_21 : f32 to vector<1x1xf32>
      %41 = arith.mulf %39, %40 : vector<1x1xf32>
      %c0_22 = arith.constant 0 : index
      %c0_23 = arith.constant 0 : index
      %42 = vector.load %arg4[%c0_22, %c0_23] : memref<1x1xf32, #tpu.memory_space<vmem>>, vector<1x1xf32>
      tpu.vector_store %arg4[%c0_22, %c0_23], %41 {strides = array<i32>} : memref<1x1xf32, #tpu.memory_space<vmem>>, vector<1x1xf32>,
    } else {
    }
    return
  }
  func.func @transform_0(%arg0: i32) -> (i32, i32) {
    %c0_i32 = arith.constant 0 : i32
    %c0_i32_0 = arith.constant 0 : i32
    return %arg0, %c0_i32 : i32, i32
  }
  func.func @transform_1(%arg0: i32) -> (i32, i32) {
    %c0_i32 = arith.constant 0 : i32
    %c0_i32_0 = arith.constant 0 : i32
    return %arg0, %c0_i32 : i32, i32
  }
  func.func @transform_2(%arg0: i32) -> (i32, i32) {
    %c0_i32 = arith.constant 0 : i32
    %c0_i32_0 = arith.constant 0 : i32
    return %arg0, %c0_i32 : i32, i32
  }
  func.func @transform_3(%arg0: i32) -> (i32, i32) {
    %c0_i32 = arith.constant 0 : i32
    %c0_i32_0 = arith.constant 0 : i32
    %c0_i32_1 = arith.constant 0 : i32
    return %c0_i32, %c0_i32_0 : i32, i32
  }
}

</mosaic_0001>

<bundles_post_ra>
// kernel: tpu_custom_call.1
= control target key start
LH: loop header
LB: loop body
LE: loop exit
PB: predicated region body
PF: predicated region fallthrough
CT: control target
= control target key end

     0   :  { %8 = vsyncpa [#allocation3], 0  ;;  %s184_s0 = inlined_call_operand.vmem [shape: f32[8,32], index: 0, kind: input, shape index: {}]   ;;  %s185_s1 = inlined_call_operand.hbm [shape: f32[8,32], index: 1, kind: input, shape index: {}]   ;;  %s186_s2 = inlined_call_operand.vmem [shape: f32[8,1], index: 2, kind: input, shape index: {}]   ;;  %s187_s3 = inlined_call_operand.hbm [shape: f32[1,1], index: 3, kind: output, shape index: {}]  }
   0x1   :  { %9 = vsyncpa [#allocation4], 0  ;;  %s146_s12 = smov [#allocation2]  }
   0x2   :  { %s18_s13 = sshll.u32 %s146_s12, 4  ;;  %s19_s13 = int_to_ptr.vmem [resolvable:$true] %s18_s13 }
   0x3   :  { %s110_s14 = scalar_lea.vmem %s19_s13, 128  ;;  %p115_p1 = scmp.lt.s32.totalorder %s19_s13, %s19_s13 }
   0x4   :  { %p111_p0 = scmp.ne.s32.totalorder %s19_s13, %s110_s14  ;;  %p116_p2 = scmp.lt.s32.totalorder %s110_s14, %s110_s14 }
   0x6   :  { %p117_p3 = por %p116_p2, %p115_p1 }
   0x8   :  { %p118_p4 = pnand %p117_p3, %p111_p0 }
   0xa   :  { %121 = shalt.err (!%p118_p4)
}
   0xb   :  { %21 = dma.hbm_to_vmem [thread:$0]  %s185_s1, 128, %s19_s13, [#allocation3]  }
   0xc   :  { %142 = dma.done.wait [#allocation3], 128  }
   0xd   :  { %143 = vsyncadd [#allocation3], 4294967168  ;;  %v33_v0 = vld [vmem:[%s184_s0] sm:$0xff]  ;;  %vm38_vm0 = vcmask 261120   ;;  %vm31_vm1 = vcmask 0   ;;  %v147_v6 = vmov 0.0  }
   0xe   :  { %v34_v1 = vld [vmem:[#allocation2] sm:$0xff]  ;;  %32 = vst.msk [vmem:[#allocation5] sm:$0x1] %vm31_vm1, %v147_v6  ;;  %vm65_vm4 = vcmask 7168  }
   0xf   :  { %v35_v2 = vsub.f32 %v33_v0, %v34_v1  ;;  %v49_v13 = vld [vmem:[%s186_s2] sm:$0xff]  ;;  %s148_s2 = smov [#allocation5]  }
  0x10   :  { %v52_v16 = vsub.f32 1.0, %v49_v13  ;;  %s88_s19 = sshll.u32 %s148_s2, 4  ;;  %s89_s19 = int_to_ptr.vmem [resolvable:$true] %s88_s19 }
  0x11   :  { %v36_v3 = vadd.f32 1e-06, %v35_v2  ;;  %s122_s20 = scalar_lea.vmem %s89_s19, 16  ;;  %s126_s21 = scalar_lea.vmem %s89_s19, 32 }
  0x12   :  { %p123_p5 = scmp.ne.s32.totalorder %s89_s19, %s122_s20  ;;  %p127_p6 = scmp.lt.s32.totalorder %s89_s19, %s89_s19 }
  0x13   :  { %v37_v4 = vmul.f32 %v36_v3, %v36_v3  ;;  %p128_p7 = scmp.lt.s32.totalorder %s126_s21, %s122_s20 }
  0x15   :  { %v39_v5 = vsel %vm38_vm0, %v37_v4, 0.0  ;;  %v64_v27 = vld [vmem:[#allocation5] sm:$0x1]  ;;  %p129_p8 = por %p128_p7, %p127_p6 }
  0x16   :  { %40 = vadd.xlane.f32.xlu0 %v39_v5 }
  0x17   :  { %p130_p9 = pnand %p129_p8, %p123_p5 }
  0x9f   :  { %v41_v7 = vpop.xlane.xlu0 %40 }
  0xa0   :  { %100 = vrsqrt.f32 %v41_v7  ;;  %vm44_vm2 = vcmp.eq.f32.partialorder %v41_v7, inf  ;;  %v47_v10 = vand.u32 2147483648, %v41_v7  ;;  %vm46_vm3 = vcmp.eq.f32.partialorder %v41_v7, 0.0 }
  0xa1   :  { %v53_v18 = vmul.f32 %v52_v16, %v41_v7 }
  0xad   :  { %v101_v8 = vpop.eup %100 }
  0xae   :  { %v43_v9 = vmul.f32 %v101_v8, %v41_v7 }
  0xb0   :  { %v45_v11 = vsel %vm44_vm2, %v41_v7, %v43_v9 }
  0xb1   :  { %v48_v12 = vsel %vm46_vm3, %v47_v10, %v45_v11 }
  0xb2   :  { %v50_v14 = vsub.f32 2.0, %v48_v12 }
  0xb4   :  { %v51_v15 = vmax.f32 %v50_v14, 0.0 }
  0xb6   :  { %v54_v17 = vmul.f32 %v51_v15, %v49_v13 }
  0xb8   :  { %v55_v19 = vmul.f32 %v54_v17, %v51_v15 }
  0xba   :  { %v56_v20 = vadd.f32 %v55_v19, %v53_v18 }
  0xbc   :  { %v66_v21 = vsel %vm65_vm4, %v56_v20, 0.0 }
  0xbd   :  { %v67_v22 = vrot.slane %v66_v21, 4 }
  0xbf   :  { %v68_v23 = vadd.f32 %v67_v22, %v66_v21 }
  0xc1   :  { %v69_v24 = vrot.slane %v68_v23, 2 }
  0xc3   :  { %v70_v25 = vadd.f32 %v69_v24, %v68_v23 }
  0xc5   :  { %v71_v26 = vrot.slane %v70_v25, 1 }
  0xc7   :  { %v72_v28 = vadd.f32 %v71_v26, %v70_v25 }
  0xc9   :  { %v73_v29 = vadd.f32 %v72_v28, %v64_v27 }
  0xcb   :  { %75 = vst.msk [vmem:[#allocation5] sm:$0x1] %vm31_vm1, %v73_v29 }
  0xd2   :  { %v79_v30 = vld [vmem:[#allocation5] sm:$0x1] }
  0xd3   :  { %v80_v31 = vmul.f32 0.125, %v79_v30 }
  0xd5   :  { %81 = vst.msk [vmem:[#allocation5] sm:$0x1] %vm31_vm1, %v80_v31 }
  0xd6   :  { %133 = shalt.err (!%p130_p9)
}
  0xd7   :  { %91 = dma.vmem_to_hbm [thread:$0]  %s89_s19, 16, %s187_s3, [#allocation4]  }
  0xd8   :  { %144 = dma.done.wait [#allocation4], 16  }
  0xd9   :  { %145 = vsyncadd [#allocation4], 4294967280 }
  0xda   :  { %95 = vsyncpa [#allocation3], 1 }
  0xdb   :  { %96 = vsyncpa [#allocation4], 1 }

</bundles_post_ra>
